<compile_context>
chip_gen: v7x
topology: tpu7x:2x2x1
jax: 0.10.0
libtpu: 0.0.40
codegen_flags: <defaults>
</compile_context>

<pallas_src>
import jax
import jax.numpy as jnp
from jax.experimental import pallas as pl
from jax.experimental.pallas import tpu as pltpu

# ---- problem sizes (small, consistent with the module) ----
B = 8            # batch of independent graphs
N = 16           # number of graph nodes per graph
IN_F = 32        # in_features
OUT_F = 16       # out_features
ALPHA = 0.2      # LeakyReLU negative slope
DROPOUT = 0.6    # dropout prob (inference mode -> identity)
LANES = 128      # padded feature width -> lane-dense stores
BN = B * N       # 128 -> one full sublane/lane-dense tile


def gat_kernel(x_ref, adj_ref, wp_ref, o_ref):
    # [h | s | 0] = x @ [W | W@(a1+a2) | 0]        (BN, LANES), one MXU pass
    hs = jnp.dot(x_ref[...], wp_ref[...], preferred_element_type=jnp.float32)

    # attention logits: e_i = LeakyReLU(s_i), constant across j (faithful to
    # the source module's repeat/view where both a_input halves are h_i)
    s = hs[:, OUT_F:OUT_F + 1]                      # (BN, 1)
    e_col = jnp.where(s > 0, s, ALPHA * s)          # (BN, 1)

    # block-diagonal adjacency mask + softmax over neighbors.  Off-graph
    # columns get -9e15 so their exp underflows to 0 -> row softmax over the
    # full 128 columns == per-graph softmax of the reference.
    adj = adj_ref[...]                              # (BN, BN) block-diagonal
    masked = jnp.where(adj > 0, e_col, -9e15)       # (BN, BN)
    m = jnp.max(masked, axis=1, keepdims=True)
    p = jnp.exp(masked - m)
    inv = pl.reciprocal(jnp.sum(p, axis=1, keepdims=True), approx=True)  # EUP
    attn = p * inv

    # TODO(synk): F.dropout(attention, p=0.6, training=True) not implemented;
    # inference-mode identity (could use pltpu.prng_seed/prng_random_bits).

    # h' = attn @ [h | s | 0]; extra lanes ride along for free on the MXU and
    # are sliced off in the wrapper.                 (BN, LANES)
    hp = jnp.dot(attn, hs, preferred_element_type=jnp.float32)

    # concat=True -> ELU (clamp the unselected exp branch to avoid overflow)
    o_ref[...] = jnp.where(hp > 0, hp, jnp.exp(jnp.minimum(hp, 0.0)) - 1.0)


def gat_forward(x, adj, W, a):
    # Fold the attention vector into W (both a_input halves equal h_i):
    #   s = h @ (a[:F] + a[F:]) = x @ (W @ (a[:F] + a[F:]))
    wa = W @ (a[:OUT_F] + a[OUT_F:])                                   # (IN_F, 1)
    Wp = jnp.concatenate(
        [W, wa, jnp.zeros((IN_F, LANES - OUT_F - 1), jnp.float32)], axis=1)

    # Layout plumbing (not compute hoisting): flatten the batch of graphs to a
    # single sublane/lane-dense (B*N, *) problem and express the per-graph
    # adjacency as a block-diagonal (B*N, B*N) mask, so the kernel is two
    # dense 128-wide MXU matmuls in one grid step.
    x2d = x.reshape(BN, IN_F)
    adj_bd = (jnp.eye(B, dtype=adj.dtype)[:, None, :, None]
              * adj[:, :, None, :]).reshape(BN, BN)

    out = pl.pallas_call(
        gat_kernel,
        out_shape=jax.ShapeDtypeStruct((BN, LANES), jnp.float32),
        grid=(1,),
        in_specs=[
            pl.BlockSpec((BN, IN_F), lambda i: (0, 0)),
            pl.BlockSpec((BN, BN), lambda i: (0, 0)),
            pl.BlockSpec((IN_F, LANES), lambda i: (0, 0)),
        ],
        out_specs=pl.BlockSpec((BN, LANES), lambda i: (0, 0)),
        compiler_params=pltpu.CompilerParams(
            dimension_semantics=("arbitrary",)),
    )(x2d, adj_bd, Wp)
    return out[:, :OUT_F].reshape(B, N, OUT_F)


def xavier_uniform(key, shape, gain):
    fan_in, fan_out = shape[0], shape[1]
    bound = gain * jnp.sqrt(6.0 / (fan_in + fan_out))
    return jax.random.uniform(key, shape, jnp.float32, -bound, bound)


def gat_reference(x, adj, W, a):
    """Pure-JAX reference with the same (faithful) semantics."""
    def one(xg, ag):
        h = xg @ W
        s = h @ a[:OUT_F] + h @ a[OUT_F:]           # both a_input halves = h_i
        e = jnp.where(s > 0, s, ALPHA * s)          # (N, 1), const across j
        masked = jnp.where(ag > 0, jnp.broadcast_to(e, (N, N)), -9e15)
        attn = jax.nn.softmax(masked, axis=1)
        hp = attn @ h
        return jnp.where(hp > 0, hp, jnp.exp(jnp.minimum(hp, 0.0)) - 1.0)
    return jax.vmap(one)(x, adj)


if __name__ == "__main__":
    key = jax.random.PRNGKey(0)
    k_x, k_adj, k_w, k_a = jax.random.split(key, 4)

    # deterministic parameter init (matches nn.init.xavier_uniform_, gain=1.414)
    W = xavier_uniform(k_w, (IN_F, OUT_F), gain=1.414)
    a = xavier_uniform(k_a, (2 * OUT_F, 1), gain=1.414)

    # deterministic inputs: batch of B graphs with self loops
    x = jax.random.normal(k_x, (B, N, IN_F), dtype=jnp.float32)
    adj = (jax.random.uniform(k_adj, (B, N, N)) > 0.5).astype(jnp.float32)
    adj = jnp.maximum(adj, jnp.eye(N, dtype=jnp.float32))

    out = gat_forward(x, adj, W, a)
    jax.block_until_ready(out)
    assert out.shape == (B, N, OUT_F)

    ref = gat_reference(x, adj, W, a)
    max_err = float(jnp.max(jnp.abs(out - ref)))
    assert max_err < 1e-2, f"mismatch vs reference: {max_err}"
    print("KERNEL_OK")
</pallas_src>

<mosaic_0001>
module attributes {stable_mosaic.version = 11 : i64} {
  func.func @gat_kernel(%arg0: i32, %arg1: memref<128x32xf32, #tpu.memory_space<vmem>>, %arg2: memref<128x128xf32, #tpu.memory_space<vmem>>, %arg3: memref<32x128xf32, #tpu.memory_space<vmem>>, %arg4: memref<128x128xf32, #tpu.memory_space<vmem>>) attributes {dimension_semantics = [#tpu.dimension_semantics<arbitrary>], iteration_bounds = array<i64: 1>, scalar_prefetch = 0 : i64, scratch_operands = 0 : i64, tpu.core_type = #tpu.core_type<tc>, window_params = [{pipeline_mode = #tpu.pipeline_mode<synchronous>, transform_indices = @transform_0, window_bounds = array<i64: 128, 32>}, {pipeline_mode = #tpu.pipeline_mode<synchronous>, transform_indices = @transform_1, window_bounds = array<i64: 128, 128>}, {pipeline_mode = #tpu.pipeline_mode<synchronous>, transform_indices = @transform_2, window_bounds = array<i64: 32, 128>}, {pipeline_mode = #tpu.pipeline_mode<synchronous>, transform_indices = @transform_3, window_bounds = array<i64: 128, 128>}]} {
    %c0 = arith.constant 0 : index
    %c0_0 = arith.constant 0 : index
    %0 = vector.load %arg1[%c0, %c0_0] : memref<128x32xf32, #tpu.memory_space<vmem>>, vector<128x32xf32>
    %c0_1 = arith.constant 0 : index
    %c0_2 = arith.constant 0 : index
    %1 = vector.load %arg3[%c0_1, %c0_2] : memref<32x128xf32, #tpu.memory_space<vmem>>, vector<32x128xf32>
    %cst = arith.constant dense<0.000000e+00> : vector<128x128xf32>
    %2 = tpu.matmul %0, %1, %cst {dimension_numbers = #tpu.dot_dimension_numbers<[1], [0], [0], [1], [0, 0, 1, 1], [], []>} : vector<128x32xf32>, vector<32x128xf32>, vector<128x128xf32> -> vector<128x128xf32>
    %3 = vector.extract_strided_slice %2 {offsets = [0, 16], sizes = [128, 1], strides = [1, 1]} : vector<128x128xf32> to vector<128x1xf32>
    %cst_3 = arith.constant 0.000000e+00 : f32
    %4 = vector.broadcast %cst_3 : f32 to vector<128x1xf32>
    %5 = arith.cmpf ogt, %3, %4 : vector<128x1xf32>
    %cst_4 = arith.constant 2.000000e-01 : f32
    %6 = vector.broadcast %cst_4 : f32 to vector<128x1xf32>
    %7 = arith.mulf %6, %3 : vector<128x1xf32>
    %8 = arith.select %5, %3, %7 : vector<128x1xi1>, vector<128x1xf32>
    %c0_5 = arith.constant 0 : index
    %c0_6 = arith.constant 0 : index
    %9 = vector.load %arg2[%c0_5, %c0_6] : memref<128x128xf32, #tpu.memory_space<vmem>>, vector<128x128xf32>
    %cst_7 = arith.constant 0.000000e+00 : f32
    %10 = vector.broadcast %cst_7 : f32 to vector<128x128xf32>
    %11 = arith.cmpf ogt, %9, %10 : vector<128x128xf32>
    %cst_8 = arith.constant -9.000000e+15 : f32
    %12 = vector.shape_cast %8 : vector<128x1xf32> to vector<128x1xf32>
    %13 = vector.broadcast %12 : vector<128x1xf32> to vector<128x128xf32>
    %14 = vector.broadcast %cst_8 : f32 to vector<128x128xf32>
    %15 = arith.select %11, %13, %14 : vector<128x128xi1>, vector<128x128xf32>
    %cst_9 = arith.constant dense<0xFF800000> : vector<128xf32>
    %16 = vector.multi_reduction <maximumf>, %15, %cst_9 [1] : vector<128x128xf32> to vector<128xf32>
    %17 = vector.shape_cast %16 : vector<128xf32> to vector<128x1xf32>
    %18 = vector.broadcast %17 : vector<128x1xf32> to vector<128x128xf32>
    %19 = arith.subf %15, %18 : vector<128x128xf32>
    %20 = math.exp %19 : vector<128x128xf32>
    %cst_10 = arith.constant dense<0.000000e+00> : vector<128xf32>
    %21 = vector.multi_reduction <add>, %20, %cst_10 [1] : vector<128x128xf32> to vector<128xf32>
    %22 = vector.shape_cast %21 : vector<128xf32> to vector<128x1xf32>
    %23 = tpu.reciprocal %22 {approx = true} : vector<128x1xf32> -> vector<128x1xf32>
    %24 = vector.broadcast %23 : vector<128x1xf32> to vector<128x128xf32>
    %25 = arith.mulf %20, %24 : vector<128x128xf32>
    %cst_11 = arith.constant dense<0.000000e+00> : vector<128x128xf32>
    %26 = tpu.matmul %25, %2, %cst_11 {dimension_numbers = #tpu.dot_dimension_numbers<[1], [0], [0], [1], [0, 0, 1, 1], [], []>} : vector<128x128xf32>, vector<128x128xf32>, vector<128x128xf32> -> vector<128x128xf32>
    %cst_12 = arith.constant 0.000000e+00 : f32
    %27 = vector.broadcast %cst_12 : f32 to vector<128x128xf32>
    %28 = arith.cmpf ogt, %26, %27 : vector<128x128xf32>
    %cst_13 = arith.constant 0.000000e+00 : f32
    %29 = vector.broadcast %cst_13 : f32 to vector<128x128xf32>
    %30 = arith.minimumf %26, %29 : vector<128x128xf32>
    %31 = math.exp %30 : vector<128x128xf32>
    %cst_14 = arith.constant 1.000000e+00 : f32
    %32 = vector.broadcast %cst_14 : f32 to vector<128x128xf32>
    %33 = arith.subf %31, %32 : vector<128x128xf32>
    %34 = arith.select %28, %26, %33 : vector<128x128xi1>, vector<128x128xf32>
    %c0_15 = arith.constant 0 : index
    %c0_16 = arith.constant 0 : index
    %35 = vector.load %arg4[%c0_15, %c0_16] : memref<128x128xf32, #tpu.memory_space<vmem>>, vector<128x128xf32>
    tpu.vector_store %arg4[%c0_15, %c0_16], %34 {strides = array<i32>} : memref<128x128xf32, #tpu.memory_space<vmem>>, vector<128x128xf32>,
    return
  }
  func.func @transform_0(%arg0: i32) -> (i32, i32) {
    %c0_i32 = arith.constant 0 : i32
    %c0_i32_0 = arith.constant 0 : i32
    %c0_i32_1 = arith.constant 0 : i32
    return %c0_i32, %c0_i32_0 : i32, i32
  }
  func.func @transform_1(%arg0: i32) -> (i32, i32) {
    %c0_i32 = arith.constant 0 : i32
    %c0_i32_0 = arith.constant 0 : i32
    %c0_i32_1 = arith.constant 0 : i32
    return %c0_i32, %c0_i32_0 : i32, i32
  }
  func.func @transform_2(%arg0: i32) -> (i32, i32) {
    %c0_i32 = arith.constant 0 : i32
    %c0_i32_0 = arith.constant 0 : i32
    %c0_i32_1 = arith.constant 0 : i32
    return %c0_i32, %c0_i32_0 : i32, i32
  }
  func.func @transform_3(%arg0: i32) -> (i32, i32) {
    %c0_i32 = arith.constant 0 : i32
    %c0_i32_0 = arith.constant 0 : i32
    %c0_i32_1 = arith.constant 0 : i32
    return %c0_i32, %c0_i32_0 : i32, i32
  }
}

</mosaic_0001>

<bundles_post_ra>
// kernel: tpu_custom_call.1
= control target key start
LH: loop header
LB: loop body
LE: loop exit
PB: predicated region body
PF: predicated region fallthrough
CT: control target
= control target key end

     0   :  { %vm35_vm0 = vcmask 261120   ;;  %s1496_s0 = inlined_call_operand.vmem [shape: f32[128,32], index: 0, kind: input, shape index: {}]   ;;  %s1497_s1 = inlined_call_operand.vmem [shape: f32[128,128], index: 1, kind: input, shape index: {}]   ;;  %s1498_s2 = inlined_call_operand.vmem [shape: f32[32,128], index: 2, kind: input, shape index: {}]   ;;  %s1499_s3 = inlined_call_operand.hbm [shape: f32[128,128], index: 3, kind: output, shape index: {}]  }
   0x1   :  { %v31_v0 = vld [vmem:[%s1498_s2] sm:$0xff]  ;;  %v32_v1 = vld [vmem:[%s1498_s2 + $0x8] sm:$0xff]  ;;  %v33_v2 = vld [vmem:[%s1498_s2 + $0x10] sm:$0xff] }
   0x2   :  { %v994_v3 = vpack.c.bf16 %v32_v1, %v31_v0  ;;  %v34_v4 = vld [vmem:[%s1498_s2 + $0x18] sm:$0xff]  ;;  %v15_v5 = vld [vmem:[%s1496_s0] sm:$0xff] }
   0x3   :  { %v998_v6 = vpack.c.bf16 %v34_v4, %v33_v2  ;;  %914 = vmatprep.mubr.msk.f32.mxu0 %vm35_vm0, %v15_v5 }
   0x4   :  { %995 = vmatprep.subr.bf16.mxu0 %v994_v3 }
   0x5   :  { %997 = vmatpush3.bf16.msra.mxu0 %v994_v3 }
   0x6   :  { %999 = vmatprep.subr.bf16.mxu0 %v998_v6 }
   0x7   :  { %8 = vsyncpa [#allocation3], 0  ;;  %v16_v7 = vld [vmem:[%s1496_s0 + $0x8] sm:$0xff]  ;;  %v17_v8 = vld [vmem:[%s1496_s0 + $0x10] sm:$0xff]  ;;  %v1176_v22 = vmov 16  }
   0x8   :  { %v18_v9 = vld [vmem:[%s1496_s0 + $0x18] sm:$0xff]  ;;  %v19_v10 = vld [vmem:[%s1496_s0 + $0x20] sm:$0xff]  ;;  %v20_v11 = vld [vmem:[%s1496_s0 + $0x28] sm:$0xff]  ;;  %1054 = vset.pattern.permute.xlu0 %v1176_v22  ;;  %1055 = vset.pattern.permute.xlu1 %v1176_v22 }
   0x9   :  { %1001 = vmatpush3.bf16.msra.mxu0 %v998_v6  ;;  %v21_v12 = vld [vmem:[%s1496_s0 + $0x30] sm:$0xff]  ;;  %v22_v13 = vld [vmem:[%s1496_s0 + $0x38] sm:$0xff]  ;;  %v23_v14 = vld [vmem:[%s1496_s0 + $0x40] sm:$0xff] }
   0xa   :  { %v24_v15 = vld [vmem:[%s1496_s0 + $0x48] sm:$0xff]  ;;  %v25_v16 = vld [vmem:[%s1496_s0 + $0x50] sm:$0xff]  ;;  %v26_v17 = vld [vmem:[%s1496_s0 + $0x58] sm:$0xff] }
   0xb   :  { %v27_v18 = vld [vmem:[%s1496_s0 + $0x60] sm:$0xff]  ;;  %v28_v19 = vld [vmem:[%s1496_s0 + $0x68] sm:$0xff]  ;;  %v29_v20 = vld [vmem:[%s1496_s0 + $0x70] sm:$0xff] }
   0xc   :  { %915 = vmatmul.mubr.msk.f32.vlgmr.msra.gmra.mrb[0].mxu0 %vm35_vm0, %v16_v7  ;;  %v30_v21 = vld [vmem:[%s1496_s0 + $0x78] sm:$0xff] }
   0xd   :  { %917 = vmatprep.mubr.msk.f32.mxu0 %vm35_vm0, %v17_v8  ;;  %v284_v22 = vld [vmem:[%s1497_s1 + $0x38] sm:$0xff] }
  0x10   :  { %918 = vmatmul.mubr.msk.f32.gmra.mrb[2].mxu0 %vm35_vm0, %v18_v9 }
  0x11   :  { %920 = vmatprep.mubr.msk.f32.mxu0 %vm35_vm0, %v19_v10 }
  0x14   :  { %921 = vmatmul.mubr.msk.f32.gmra.mrb[4].mxu0 %vm35_vm0, %v20_v11 }
  0x15   :  { %923 = vmatprep.mubr.msk.f32.mxu0 %vm35_vm0, %v21_v12 }
  0x18   :  { %924 = vmatmul.mubr.msk.f32.gmra.mrb[6].mxu0 %vm35_vm0, %v22_v13 }
  0x19   :  { %926 = vmatprep.mubr.msk.f32.mxu0 %vm35_vm0, %v23_v14 }
  0x1c   :  { %927 = vmatmul.mubr.msk.f32.gmra.mrb[8].mxu0 %vm35_vm0, %v24_v15  ;;  %v278_v15 = vld [vmem:[%s1497_s1 + $0x8] sm:$0xff] }
  0x1d   :  { %929 = vmatprep.mubr.msk.f32.mxu0 %vm35_vm0, %v25_v16  ;;  %v277_v16 = vld [vmem:[%s1497_s1] sm:$0xff] }
  0x20   :  { %930 = vmatmul.mubr.msk.f32.gmra.mrb[10].mxu0 %vm35_vm0, %v26_v17 }
  0x21   :  { %932 = vmatprep.mubr.msk.f32.mxu0 %vm35_vm0, %v27_v18 }
  0x24   :  { %933 = vmatmul.mubr.msk.f32.gmra.mrb[12].mxu0 %vm35_vm0, %v28_v19 }
  0x25   :  { %935 = vmatprep.mubr.msk.f32.mxu0 %vm35_vm0, %v29_v20 }
  0x28   :  { %936 = vmatmul.mubr.msk.f32.gmra.mrb[14].mxu0 %vm35_vm0, %v30_v21 }
  0xdf   :  { %v916_v23 = vpop.f32.mrb[0].mxu0 }
  0xe0   :  { %v150_v24 = vpop.f32.mrb[1].mxu0  ;;  %vm230_vm1 = vcmp.gt.f32.partialorder %v916_v23, 0.0  ;;  %v246_v25 = vmul.f32 0.2, %v916_v23 }
  0xe1   :  { %v1002_v26 = vpack.c.bf16 %v916_v23, %v150_v24  ;;  %v245_v27 = vmul.f32 0.2, %v150_v24  ;;  %vm229_vm2 = vcmp.gt.f32.partialorder %v150_v24, 0.0 }
  0xe2   :  { %v262_v28 = vsel %vm230_vm1, %v916_v23, %v246_v25  ;;  %vm294_vm1 = vcmp.gt.f32.partialorder %v278_v15, 0.0  ;;  %v279_v25 = vld [vmem:[%s1497_s1 + $0x10] sm:$0xff] }
  0xe3   :  { %316 = vperm.xlu0 %1054, %v262_v28   ;;  %1003 = vmatprep.subr.bf16.mxu0 %v1002_v26  ;;  %v919_v29 = vpop.f32.mrb[2].mxu0  ;;  %v261_v33 = vsel %vm229_vm2, %v150_v24, %v245_v27  ;;  %vm293_vm2 = vcmp.gt.f32.partialorder %v277_v16, 0.0  ;;  %v283_v24 = vld [vmem:[%s1497_s1 + $0x30] sm:$0xff] }
  0xe4   :  { %1034 = vmatprep.subr.bf16.mxu1 %v1002_v26  ;;  %1005 = vmatpush3.bf16.msra.mxu0 %v1002_v26  ;;  %v160_v30 = vpop.f32.mrb[3].mxu0  ;;  %v248_v32 = vmul.f32 0.2, %v919_v29  ;;  %vm232_vm3 = vcmp.gt.f32.partialorder %v919_v29, 0.0 }
  0xe5   :  { %1042 = vmatpush3.bf16.msra.mxu1 %v1002_v26  ;;  %v1006_v31 = vpack.c.bf16 %v919_v29, %v160_v30  ;;  %v247_v37 = vmul.f32 0.2, %v160_v30  ;;  %vm231_vm4 = vcmp.gt.f32.partialorder %v160_v30, 0.0 }
  0xe6   :  { %v264_v38 = vsel %vm232_vm3, %v919_v29, %v248_v32  ;;  %vm300_vm3 = vcmp.gt.f32.partialorder %v284_v22, 0.0  ;;  %v286_v29 = vld [vmem:[%s1497_s1 + $0x48] sm:$0xff] }
  0xe7   :  { %311 = vperm.xlu0 %1054, %v261_v33   ;;  %v1276_v34 = vpop.f32.mrb[4].mxu0  ;;  %1007 = vmatprep.subr.bf16.mxu0 %v1006_v31  ;;  %v263_v43 = vsel %vm231_vm4, %v160_v30, %v247_v37  ;;  %vm299_vm4 = vcmp.gt.f32.partialorder %v283_v24, 0.0  ;;  %v280_v30 = vld [vmem:[%s1497_s1 + $0x18] sm:$0xff] }
  0xe8   :  { %v1278_v35 = vpop.f32.mrb[5].mxu0  ;;  %1035 = vmatprep.subr.bf16.mxu1 %v1006_v31  ;;  %1009 = vmatpush3.bf16.msra.mxu0 %v1006_v31  ;;  %v250_v0 = vmul.f32 0.2, %v1276_v34  ;;  %vm234_vm12 = vcmp.gt.f32.partialorder %v1276_v34, 0.0 }
  0xe9   :  { %v1010_v36 = vpack.c.bf16 %v1276_v34, %v1278_v35  ;;  %1043 = vmatpush3.bf16.msra.mxu1 %v1006_v31  ;;  %v249_v57 = vmul.f32 0.2, %v1278_v35  ;;  %vm233_vm10 = vcmp.gt.f32.partialorder %v1278_v35, 0.0 }
  0xea   :  { %v266_v7 = vsel %vm234_vm12, %v1276_v34, %v250_v0 }
  0xeb   :  { %326 = vperm.xlu0 %1054, %v264_v38   ;;  %v925_v39 = vpop.f32.mrb[6].mxu0  ;;  %1011 = vmatprep.subr.bf16.mxu0 %v1010_v36  ;;  %v265_v1 = vsel %vm233_vm10, %v1278_v35, %v249_v57  ;;  %v285_v35 = vld [vmem:[%s1497_s1 + $0x40] sm:$0xff] }
  0xec   :  { %v180_v40 = vpop.f32.mrb[7].mxu0  ;;  %1036 = vmatprep.subr.bf16.mxu1 %v1010_v36  ;;  %1013 = vmatpush3.bf16.msra.mxu0 %v1010_v36  ;;  %v252_v42 = vmul.f32 0.2, %v925_v39  ;;  %vm236_vm5 = vcmp.gt.f32.partialorder %v925_v39, 0.0 }
  0xed   :  { %v1014_v41 = vpack.c.bf16 %v925_v39, %v180_v40  ;;  %1044 = vmatpush3.bf16.msra.mxu1 %v1010_v36  ;;  %v251_v49 = vmul.f32 0.2, %v180_v40  ;;  %vm235_vm8 = vcmp.gt.f32.partialorder %v180_v40, 0.0  ;;  %v281_v36 = vld [vmem:[%s1497_s1 + $0x20] sm:$0xff] }
  0xee   :  { %v268_v50 = vsel %vm236_vm5, %v925_v39, %v252_v42  ;;  %vm295_vm5 = vcmp.gt.f32.partialorder %v279_v25, 0.0  ;;  %v282_v42 = vld [vmem:[%s1497_s1 + $0x28] sm:$0xff] }
  0xef   :  { %321 = vperm.xlu0 %1054, %v263_v43   ;;  %v928_v44 = vpop.f32.mrb[8].mxu0  ;;  %1015 = vmatprep.subr.bf16.mxu0 %v1014_v41  ;;  %v267_v58 = vsel %vm235_vm8, %v180_v40, %v251_v49  ;;  %vm301_vm8 = vcmp.gt.f32.partialorder %v285_v35, 0.0 }
  0xf0   :  { %1037 = vmatprep.subr.bf16.mxu1 %v1014_v41  ;;  %1017 = vmatpush3.bf16.msra.mxu0 %v1014_v41  ;;  %vm238_vm6 = vcmp.gt.f32.partialorder %v928_v44, 0.0  ;;  %v254_v45 = vmul.f32 0.2, %v928_v44  ;;  %v190_v46 = vpop.f32.mrb[9].mxu0 }
  0xf1   :  { %1045 = vmatpush3.bf16.msra.mxu1 %v1014_v41  ;;  %v253_v47 = vmul.f32 0.2, %v190_v46  ;;  %v1018_v48 = vpack.c.bf16 %v928_v44, %v190_v46  ;;  %vm237_vm7 = vcmp.gt.f32.partialorder %v190_v46, 0.0  ;;  %v288_v41 = vld [vmem:[%s1497_s1 + $0x58] sm:$0xff] }
  0xf2   :  { %v270_v51 = vsel %vm238_vm6, %v928_v44, %v254_v45  ;;  %vm302_vm6 = vcmp.gt.f32.partialorder %v286_v29, 0.0  ;;  %vm304_vm10 = vcmp.gt.f32.partialorder %v288_v41, 0.0 }
  0xf3   :  { %346 = vperm.xlu0 %1054, %v268_v50   ;;  %356 = vperm.xlu1 %1055, %v270_v51   ;;  %v931_v52 = vpop.f32.mrb[10].mxu0  ;;  %v269_v53 = vsel %vm237_vm7, %v190_v46, %v253_v47  ;;  %vm296_vm7 = vcmp.gt.f32.partialorder %v280_v30, 0.0  ;;  %v287_v47 = vld [vmem:[%s1497_s1 + $0x50] sm:$0xff]  ;;  %v290_v51 = vld [vmem:[%s1497_s1 + $0x68] sm:$0xff] }
  0xf4   :  { %v256_v54 = vmul.f32 0.2, %v931_v52  ;;  %1019 = vmatprep.subr.bf16.mxu0 %v1018_v48  ;;  %1038 = vmatprep.subr.bf16.mxu1 %v1018_v48  ;;  %v200_v55 = vpop.f32.mrb[11].mxu0  ;;  %vm240_vm9 = vcmp.gt.f32.partialorder %v931_v52, 0.0  ;;  %vm303_vm12 = vcmp.gt.f32.partialorder %v287_v47, 0.0 }
  0xf5   :  { %1021 = vmatpush3.bf16.msra.mxu0 %v1018_v48  ;;  %1046 = vmatpush3.bf16.msra.mxu1 %v1018_v48  ;;  %v1022_v56 = vpack.c.bf16 %v931_v52, %v200_v55  ;;  %v255_v61 = vmul.f32 0.2, %v200_v55  ;;  %vm239_vm11 = vcmp.gt.f32.partialorder %v200_v55, 0.0 }
  0xf6   :  { %v272_v60 = vsel %vm240_vm9, %v931_v52, %v256_v54  ;;  %vm297_vm9 = vcmp.gt.f32.partialorder %v281_v36, 0.0  ;;  %v289_v54 = vld [vmem:[%s1497_s1 + $0x60] sm:$0xff] }
  0xf7   :  { %341 = vperm.xlu0 %1054, %v267_v58   ;;  %351 = vperm.xlu1 %1055, %v269_v53   ;;  %v934_v59 = vpop.f32.mrb[12].mxu0  ;;  %v271_v3 = vsel %vm239_vm11, %v200_v55, %v255_v61  ;;  %vm298_vm11 = vcmp.gt.f32.partialorder %v282_v42, 0.0 }
  0xf8   :  { %1023 = vmatprep.subr.bf16.mxu0 %v1022_v56  ;;  %1039 = vmatprep.subr.bf16.mxu1 %v1022_v56  ;;  %v210_v62 = vpop.f32.mrb[13].mxu0  ;;  %v258_v4 = vmul.f32 0.2, %v934_v59  ;;  %vm242_vm13 = vcmp.gt.f32.partialorder %v934_v59, 0.0 }
  0xf9   :  { %1025 = vmatpush3.bf16.msra.mxu0 %v1022_v56  ;;  %1047 = vmatpush3.bf16.msra.mxu1 %v1022_v56  ;;  %v1026_v63 = vpack.c.bf16 %v934_v59, %v210_v62  ;;  %v257_v9 = vmul.f32 0.2, %v210_v62  ;;  %vm241_vm14 = vcmp.gt.f32.partialorder %v210_v62, 0.0  ;;  %v291_v56 = vld [vmem:[%s1497_s1 + $0x70] sm:$0xff] }
  0xfa   :  { %v274_v8 = vsel %vm242_vm13, %v934_v59, %v258_v4  ;;  %vm306_vm13 = vcmp.gt.f32.partialorder %v290_v51, 0.0  ;;  %v292_v59 = vld [vmem:[%s1497_s1 + $0x78] sm:$0xff]  ;;  %s1177_s1 = smov [#allocation2]  }
  0xfb   :  { %331 = vperm.xlu0 %1054, %v265_v1   ;;  %366 = vperm.xlu1 %1055, %v272_v60   ;;  %v937_v2 = vpop.f32.mrb[14].mxu0  ;;  %v273_v10 = vsel %vm241_vm14, %v210_v62, %v257_v9  ;;  %vm305_vm14 = vcmp.gt.f32.partialorder %v289_v54, 0.0  ;;  %s811_s2 = sshll.u32 %s1177_s1, 4  ;;  %s812_s2 = int_to_ptr.vmem [resolvable:$true] %s811_s2 }
  0xfc   :  { %v220_v5 = vpop.f32.mrb[15].mxu0  ;;  %1027 = vmatprep.subr.bf16.mxu0 %v1026_v63  ;;  %1040 = vmatprep.subr.bf16.mxu1 %v1026_v63  ;;  %v260_v12 = vmul.f32 0.2, %v937_v2  ;;  %vm244_vm0 = vcmp.gt.f32.partialorder %v937_v2, 0.0  ;;  %s1152_s26 = scalar_lea.vmem %s812_s2, 2048  ;;  %p1157_p1 = scmp.lt.s32.totalorder %s812_s2, %s812_s2 }
  0xfd   :  { %v1030_v6 = vpack.c.bf16 %v937_v2, %v220_v5  ;;  %1029 = vmatpush3.bf16.msra.mxu0 %v1026_v63  ;;  %1048 = vmatpush3.bf16.msra.mxu1 %v1026_v63  ;;  %v259_v11 = vmul.f32 0.2, %v220_v5  ;;  %vm243_vm15 = vcmp.gt.f32.partialorder %v220_v5, 0.0  ;;  %p1153_p0 = scmp.ne.s32.totalorder %s812_s2, %s1152_s26  ;;  %p1158_p2 = scmp.lt.s32.totalorder %s1152_s26, %s1152_s26 }
  0xfe   :  { %v276_v14 = vsel %vm244_vm0, %v937_v2, %v260_v12  ;;  %vm308_vm0 = vcmp.gt.f32.partialorder %v292_v59, 0.0 }
  0xff   :  { %336 = vperm.xlu0 %1054, %v266_v7   ;;  %361 = vperm.xlu1 %1055, %v271_v3   ;;  %v275_v13 = vsel %vm243_vm15, %v220_v5, %v259_v11  ;;  %vm307_vm15 = vcmp.gt.f32.partialorder %v291_v56, 0.0  ;;  %p1159_p3 = por %p1158_p2, %p1157_p1 }
 0x100   :  { %1031 = vmatprep.subr.bf16.mxu0 %v1030_v6  ;;  %1041 = vmatprep.subr.bf16.mxu1 %v1030_v6 }
 0x101   :  { %1033 = vmatpush3.bf16.msra.mxu0 %v1030_v6  ;;  %1049 = vmatpush3.bf16.msra.mxu1 %v1030_v6  ;;  %p1160_p4 = pnand %p1159_p3, %p1153_p0 }
 0x103   :  { %376 = vperm.xlu1 %1055, %v274_v8  }
 0x107   :  { %371 = vperm.xlu1 %1055, %v273_v10  }
 0x10b   :  { %381 = vperm.xlu1 %1055, %v275_v13  }
 0x10f   :  { %386 = vperm.xlu1 %1055, %v276_v14  }
 0x162   :  { %v317_v17 = vpop.permute.xlu0 %316 }
 0x163   :  { %v1294_v18 = vsel %vm294_vm1, %v317_v17, -9e+15 }
 0x164   :  { %407 = vmax.xlane.f32.xlu1 %v1294_v18 }
 0x166   :  { %v312_v19 = vpop.permute.xlu0 %311 }
 0x167   :  { %v1297_v20 = vsel %vm293_vm2, %v312_v19, -9e+15 }
 0x168   :  { %405 = vmax.xlane.f32.xlu1 %v1297_v20 }
 0x16a   :  { %v327_v21 = vpop.permute.xlu0 %326 }
 0x16b   :  { %v1332_v40 = vsel %vm296_vm7, %v327_v21, -9e+15 }
 0x16e   :  { %v322_v23 = vpop.permute.xlu0 %321 }
 0x16f   :  { %v1320_v34 = vsel %vm295_vm5, %v322_v23, -9e+15 }
 0x172   :  { %v347_v26 = vpop.permute.xlu0 %346  ;;  %v357_v27 = vpop.permute.xlu1 %356 }
 0x173   :  { %v1309_v28 = vsel %vm300_vm3, %v347_v26, -9e+15  ;;  %v1330_v39 = vsel %vm302_vm6, %v357_v27, -9e+15 }
 0x174   :  { %419 = vmax.xlane.f32.xlu1 %v1309_v28 }
 0x176   :  { %v342_v31 = vpop.permute.xlu0 %341  ;;  %v352_v32 = vpop.permute.xlu1 %351 }
 0x177   :  { %v1318_v33 = vsel %vm299_vm4, %v342_v31, -9e+15  ;;  %v1342_v44 = vsel %vm301_vm8, %v352_v32, -9e+15 }
 0x178   :  { %417 = vmax.xlane.f32.xlu0 %v1318_v33  ;;  %409 = vmax.xlane.f32.xlu1 %v1320_v34 }
 0x17a   :  { %v332_v37 = vpop.permute.xlu0 %331  ;;  %v367_v38 = vpop.permute.xlu1 %366 }
 0x17b   :  { %v1344_v45 = vsel %vm297_vm9, %v332_v37, -9e+15  ;;  %v1351_v49 = vsel %vm304_vm10, %v367_v38, -9e+15 }
 0x17c   :  { %423 = vmax.xlane.f32.xlu0 %v1330_v39  ;;  %411 = vmax.xlane.f32.xlu1 %v1332_v40 }
 0x17e   :  { %v362_v43 = vpop.permute.xlu1 %361  ;;  %v337_v46 = vpop.permute.xlu0 %336 }
 0x17f   :  { %v1353_v50 = vsel %vm298_vm11, %v337_v46, -9e+15  ;;  %v1360_v52 = vsel %vm303_vm12, %v362_v43, -9e+15 }
 0x180   :  { %421 = vmax.xlane.f32.xlu0 %v1342_v44  ;;  %413 = vmax.xlane.f32.xlu1 %v1344_v45 }
 0x182   :  { %v377_v48 = vpop.permute.xlu1 %376 }
 0x183   :  { %v1366_v55 = vsel %vm306_vm13, %v377_v48, -9e+15 }
 0x184   :  { %427 = vmax.xlane.f32.xlu0 %v1351_v49  ;;  %415 = vmax.xlane.f32.xlu1 %v1353_v50 }
 0x186   :  { %v372_v53 = vpop.permute.xlu1 %371 }
 0x187   :  { %v1372_v58 = vsel %vm305_vm14, %v372_v53, -9e+15 }
 0x188   :  { %425 = vmax.xlane.f32.xlu0 %v1360_v52 }
 0x18a   :  { %v382_v57 = vpop.permute.xlu1 %381 }
 0x18b   :  { %v1378_v60 = vsel %vm307_vm15, %v382_v57, -9e+15 }
 0x18c   :  { %431 = vmax.xlane.f32.xlu0 %v1366_v55 }
 0x18e   :  { %v387_v61 = vpop.permute.xlu1 %386 }
 0x18f   :  { %v1381_v62 = vsel %vm308_vm0, %v387_v61, -9e+15 }
 0x190   :  { %429 = vmax.xlane.f32.xlu0 %v1372_v58 }
 0x194   :  { %433 = vmax.xlane.f32.xlu0 %v1378_v60 }
 0x198   :  { %435 = vmax.xlane.f32.xlu0 %v1381_v62 }
 0x1f1   :  { %v408_v63 = vpop.xlane.xlu1 %407 }
 0x1f2   :  { %v438_v0 = vsub.f32 %v1294_v18, %v408_v63 }
 0x1f4   :  { %v455_v1 = vmul.f32 1.442695, %v438_v0 }
 0x1f5   :  { %v406_v2 = vpop.xlane.xlu1 %405 }
 0x1f6   :  { %1056 = vpow2.f32 %v455_v1  ;;  %v437_v3 = vsub.f32 %v1297_v20, %v406_v2 }
 0x1f8   :  { %v453_v4 = vmul.f32 1.442695, %v437_v3 }
 0x1fa   :  { %1058 = vpow2.f32 %v453_v4 }
 0x200   :  { %v1386_v5 = vpop.eup %1056 }
 0x201   :  { %487 = vadd.xlane.f32.xlu1 %v1386_v5  ;;  %v420_v6 = vpop.xlane.xlu1 %419 }
 0x202   :  { %v444_v7 = vsub.f32 %v1309_v28, %v420_v6 }
 0x204   :  { %v1390_v8 = vpop.eup %1058  ;;  %v467_v9 = vmul.f32 1.442695, %v444_v7 }
 0x205   :  { %v418_v10 = vpop.xlane.xlu0 %417  ;;  %485 = vadd.xlane.f32.xlu1 %v1390_v8  ;;  %v410_v11 = vpop.xlane.xlu1 %409 }
 0x206   :  { %1060 = vpow2.f32 %v467_v9  ;;  %v443_v12 = vsub.f32 %v1318_v33, %v418_v10  ;;  %v439_v18 = vsub.f32 %v1320_v34, %v410_v11 }
 0x208   :  { %v465_v13 = vmul.f32 1.442695, %v443_v12  ;;  %v457_v24 = vmul.f32 1.442695, %v439_v18 }
 0x209   :  { %v424_v14 = vpop.xlane.xlu0 %423  ;;  %v412_v16 = vpop.xlane.xlu1 %411 }
 0x20a   :  { %1062 = vpow2.f32 %v465_v13  ;;  %v446_v15 = vsub.f32 %v1330_v39, %v424_v14  ;;  %v440_v25 = vsub.f32 %v1332_v40, %v412_v16 }
 0x20c   :  { %v471_v17 = vmul.f32 1.442695, %v446_v15  ;;  %v459_v30 = vmul.f32 1.442695, %v440_v25 }
 0x20d   :  { %v422_v19 = vpop.xlane.xlu0 %421  ;;  %v414_v23 = vpop.xlane.xlu1 %413 }
 0x20e   :  { %1064 = vpow2.f32 %v471_v17  ;;  %v445_v20 = vsub.f32 %v1342_v44, %v422_v19  ;;  %v441_v31 = vsub.f32 %v1344_v45, %v414_v23 }
 0x210   :  { %v1397_v21 = vpop.eup %1060  ;;  %v469_v22 = vmul.f32 1.442695, %v445_v20  ;;  %v461_v37 = vmul.f32 1.442695, %v441_v31 }
 0x211   :  { %v428_v26 = vpop.xlane.xlu0 %427  ;;  %499 = vadd.xlane.f32.xlu0 %v1397_v21  ;;  %v416_v33 = vpop.xlane.xlu1 %415 }
 0x212   :  { %1066 = vpow2.f32 %v469_v22  ;;  %v448_v27 = vsub.f32 %v1351_v49, %v428_v26  ;;  %v442_v38 = vsub.f32 %v1353_v50, %v416_v33 }
 0x213   :  { %1068 = vpow2.f32 %v457_v24 }
 0x214   :  { %v1402_v28 = vpop.eup %1062  ;;  %v475_v29 = vmul.f32 1.442695, %v448_v27  ;;  %v463_v43 = vmul.f32 1.442695, %v442_v38 }
 0x215   :  { %v426_v32 = vpop.xlane.xlu0 %425  ;;  %497 = vadd.xlane.f32.xlu1 %v1402_v28 }
 0x216   :  { %1070 = vpow2.f32 %v475_v29  ;;  %v447_v34 = vsub.f32 %v1360_v52, %v426_v32 }
 0x217   :  { %1072 = vpow2.f32 %v459_v30 }
 0x218   :  { %v1407_v35 = vpop.eup %1064  ;;  %v473_v36 = vmul.f32 1.442695, %v447_v34 }
 0x219   :  { %v432_v39 = vpop.xlane.xlu0 %431  ;;  %503 = vadd.xlane.f32.xlu0 %v1407_v35 }
 0x21a   :  { %1074 = vpow2.f32 %v473_v36  ;;  %v450_v40 = vsub.f32 %v1366_v55, %v432_v39 }
 0x21b   :  { %1076 = vpow2.f32 %v461_v37 }
 0x21c   :  { %v1412_v41 = vpop.eup %1066  ;;  %v479_v42 = vmul.f32 1.442695, %v450_v40 }
 0x21d   :  { %v430_v44 = vpop.xlane.xlu0 %429  ;;  %501 = vadd.xlane.f32.xlu1 %v1412_v41  ;;  %v1416_v46 = vpop.eup %1068 }
 0x21e   :  { %1078 = vpow2.f32 %v479_v42  ;;  %v449_v45 = vsub.f32 %v1372_v58, %v430_v44 }
 0x21f   :  { %1080 = vpow2.f32 %v463_v43 }
 0x220   :  { %v1418_v47 = vpop.eup %1070  ;;  %v477_v48 = vmul.f32 1.442695, %v449_v45 }
 0x221   :  { %v434_v49 = vpop.xlane.xlu0 %433  ;;  %507 = vadd.xlane.f32.xlu0 %v1418_v47  ;;  %489 = vadd.xlane.f32.xlu1 %v1416_v46  ;;  %v1423_v51 = vpop.eup %1072 }
 0x222   :  { %1082 = vpow2.f32 %v477_v48  ;;  %v451_v50 = vsub.f32 %v1378_v60, %v434_v49 }
 0x224   :  { %v1425_v52 = vpop.eup %1074  ;;  %v481_v53 = vmul.f32 1.442695, %v451_v50 }
 0x225   :  { %v436_v54 = vpop.xlane.xlu0 %435  ;;  %505 = vadd.xlane.f32.xlu0 %v1425_v52  ;;  %491 = vadd.xlane.f32.xlu1 %v1423_v51  ;;  %v1430_v56 = vpop.eup %1076 }
 0x226   :  { %1084 = vpow2.f32 %v481_v53  ;;  %v452_v55 = vsub.f32 %v1381_v62, %v436_v54 }
 0x228   :  { %v1432_v57 = vpop.eup %1078  ;;  %v483_v58 = vmul.f32 1.442695, %v452_v55 }
 0x229   :  { %511 = vadd.xlane.f32.xlu0 %v1432_v57  ;;  %493 = vadd.xlane.f32.xlu1 %v1430_v56  ;;  %v1436_v59 = vpop.eup %1080 }
 0x22a   :  { %1086 = vpow2.f32 %v483_v58 }
 0x22c   :  { %v1438_v60 = vpop.eup %1082 }
 0x22d   :  { %509 = vadd.xlane.f32.xlu0 %v1438_v60  ;;  %495 = vadd.xlane.f32.xlu1 %v1436_v59 }
 0x230   :  { %v1442_v61 = vpop.eup %1084 }
 0x231   :  { %513 = vadd.xlane.f32.xlu0 %v1442_v61 }
 0x234   :  { %v1445_v62 = vpop.eup %1086 }
 0x235   :  { %515 = vadd.xlane.f32.xlu0 %v1445_v62 }
 0x28e   :  { %v488_v63 = vpop.xlane.xlu1 %487 }
 0x28f   :  { %1088 = vrcp.f32 %v488_v63 }
 0x292   :  { %v486_v0 = vpop.xlane.xlu1 %485 }
 0x293   :  { %1090 = vrcp.f32 %v486_v0 }
 0x299   :  { %v1089_v1 = vpop.eup %1088 }
 0x29a   :  { %v534_v4 = vmul.f32 %v1089_v1, %v1386_v5 }
 0x29d   :  { %v1091_v2 = vpop.eup %1090 }
 0x29e   :  { %v533_v3 = vmul.f32 %v1091_v2, %v1390_v8  ;;  %v500_v6 = vpop.xlane.xlu0 %499 }
 0x29f   :  { %1092 = vrcp.f32 %v500_v6 }
 0x2a0   :  { %970 = vmatprep.mubr.f32.mxu0 %v533_v3 }
 0x2a1   :  { %971 = vmatmul.mubr.f32.vlgmr.msra.gmra.mrb[16].mxu0 %v534_v4 }
 0x2a2   :  { %v498_v7 = vpop.xlane.xlu1 %497 }
 0x2a3   :  { %1094 = vrcp.f32 %v498_v7 }
 0x2a6   :  { %v504_v9 = vpop.xlane.xlu0 %503 }
 0x2a7   :  { %1096 = vrcp.f32 %v504_v9 }
 0x2a9   :  { %v1093_v11 = vpop.eup %1092 }
 0x2aa   :  { %v502_v10 = vpop.xlane.xlu1 %501  ;;  %v540_v8 = vmul.f32 %v1093_v11, %v1397_v21 }
 0x2ab   :  { %1098 = vrcp.f32 %v502_v10 }
 0x2ad   :  { %v1095_v12 = vpop.eup %1094 }
 0x2ae   :  { %v508_v13 = vpop.xlane.xlu0 %507  ;;  %v490_v14 = vpop.xlane.xlu1 %489  ;;  %v539_v15 = vmul.f32 %v1095_v12, %v1402_v28 }
 0x2af   :  { %1100 = vrcp.f32 %v490_v14 }
 0x2b0   :  { %979 = vmatprep.mubr.f32.mxu1 %v539_v15  ;;  %1102 = vrcp.f32 %v508_v13 }
 0x2b1   :  { %980 = vmatmul.mubr.f32.vlgmr.msra.gmra.mrb[0].mxu1 %v540_v8  ;;  %v1097_v17 = vpop.eup %1096 }
 0x2b2   :  { %v506_v5 = vpop.xlane.xlu0 %505  ;;  %v492_v16 = vpop.xlane.xlu1 %491  ;;  %v542_v23 = vmul.f32 %v1097_v17, %v1407_v35 }
 0x2b3   :  { %1104 = vrcp.f32 %v506_v5 }
 0x2b4   :  { %1106 = vrcp.f32 %v492_v16 }
 0x2b5   :  { %v1099_v18 = vpop.eup %1098 }
 0x2b6   :  { %v512_v19 = vpop.xlane.xlu0 %511  ;;  %v494_v20 = vpop.xlane.xlu1 %493  ;;  %v541_v22 = vmul.f32 %v1099_v18, %v1412_v41 }
 0x2b7   :  { %1108 = vrcp.f32 %v494_v20 }
 0x2b8   :  { %982 = vmatprep.mubr.f32.mxu1 %v541_v22  ;;  %1110 = vrcp.f32 %v512_v19 }
 0x2b9   :  { %983 = vmatmul.mubr.f32.gmra.mrb[2].mxu1 %v542_v23  ;;  %v1101_v21 = vpop.eup %1100 }
 0x2ba   :  { %v510_v24 = vpop.xlane.xlu0 %509  ;;  %v496_v25 = vpop.xlane.xlu1 %495  ;;  %v535_v26 = vmul.f32 %v1101_v21, %v1416_v46 }
 0x2bb   :  { %1112 = vrcp.f32 %v510_v24  ;;  %v1103_v27 = vpop.eup %1102 }
 0x2bc   :  { %1114 = vrcp.f32 %v496_v25  ;;  %973 = vmatprep.mubr.f32.mxu0 %v535_v26  ;;  %v544_v33 = vmul.f32 %v1103_v27, %v1418_v47 }
 0x2bd   :  { %v1105_v28 = vpop.eup %1104 }
 0x2be   :  { %v1107_v29 = vpop.eup %1106  ;;  %v514_v30 = vpop.xlane.xlu0 %513  ;;  %v543_v31 = vmul.f32 %v1105_v28, %v1425_v52 }
 0x2bf   :  { %1116 = vrcp.f32 %v514_v30  ;;  %v536_v32 = vmul.f32 %v1107_v29, %v1423_v51 }
 0x2c0   :  { %985 = vmatprep.mubr.f32.mxu1 %v543_v31 }
 0x2c1   :  { %974 = vmatmul.mubr.f32.gmra.mrb[18].mxu0 %v536_v32  ;;  %986 = vmatmul.mubr.f32.gmra.mrb[4].mxu1 %v544_v33  ;;  %v1109_v34 = vpop.eup %1108 }
 0x2c2   :  { %v516_v35 = vpop.xlane.xlu0 %515  ;;  %v537_v36 = vmul.f32 %v1109_v34, %v1430_v56  ;;  %v1111_v37 = vpop.eup %1110 }
 0x2c3   :  { %1118 = vrcp.f32 %v516_v35  ;;  %v546_v42 = vmul.f32 %v1111_v37, %v1432_v57 }
 0x2c4   :  { %976 = vmatprep.mubr.f32.mxu0 %v537_v36 }
 0x2c5   :  { %v1113_v38 = vpop.eup %1112 }
 0x2c6   :  { %v1115_v39 = vpop.eup %1114  ;;  %v545_v40 = vmul.f32 %v1113_v38, %v1438_v60 }
 0x2c7   :  { %v538_v41 = vmul.f32 %v1115_v39, %v1436_v59 }
 0x2c8   :  { %988 = vmatprep.mubr.f32.mxu1 %v545_v40 }
 0x2c9   :  { %v1117_v43 = vpop.eup %1116  ;;  %977 = vmatmul.mubr.f32.gmra.mrb[20].mxu0 %v538_v41  ;;  %989 = vmatmul.mubr.f32.gmra.mrb[6].mxu1 %v546_v42 }
 0x2ca   :  { %v547_v44 = vmul.f32 %v1117_v43, %v1442_v61 }
 0x2cc   :  { %991 = vmatprep.mubr.f32.mxu1 %v547_v44 }
 0x2cd   :  { %v1119_v45 = vpop.eup %1118 }
 0x2ce   :  { %v548_v46 = vmul.f32 %v1119_v45, %v1445_v62 }
 0x2d0   :  { %992 = vmatmul.mubr.f32.gmra.mrb[8].mxu1 %v548_v46 }
 0x374   :  { %v972_v47 = vpop.f32.mrb[16].mxu0 }
 0x375   :  { %v711_v48 = vmin.f32 %v972_v47, 0.0  ;;  %v615_v49 = vpop.f32.mrb[17].mxu0  ;;  %vm695_vm1 = vcmp.gt.f32.partialorder %v972_v47, 0.0 }
 0x376   :  { %v710_v50 = vmin.f32 %v615_v49, 0.0  ;;  %vm694_vm2 = vcmp.gt.f32.partialorder %v615_v49, 0.0 }
 0x377   :  { %v728_v51 = vmul.f32 1.442695, %v711_v48 }
 0x378   :  { %v726_v52 = vmul.f32 1.442695, %v710_v50 }
 0x379   :  { %1120 = vpow2.f32 %v728_v51 }
 0x37a   :  { %1122 = vpow2.f32 %v726_v52 }
 0x383   :  { %v1121_v53 = vpop.eup %1120 }
 0x384   :  { %v1123_v54 = vpop.eup %1122  ;;  %v839_v55 = vadd.f32 -1.0, %v1121_v53  ;;  %v981_v56 = vpop.f32.mrb[0].mxu1 }
 0x385   :  { %v838_v57 = vadd.f32 -1.0, %v1123_v54  ;;  %v717_v58 = vmin.f32 %v981_v56, 0.0  ;;  %v645_v59 = vpop.f32.mrb[1].mxu1  ;;  %vm701_vm3 = vcmp.gt.f32.partialorder %v981_v56, 0.0 }
 0x386   :  { %v775_v60 = vsel %vm695_vm1, %v972_v47, %v839_v55  ;;  %v716_v61 = vmin.f32 %v645_v59, 0.0  ;;  %vm700_vm4 = vcmp.gt.f32.partialorder %v645_v59, 0.0 }
 0x387   :  { %791 = vst [vmem:[#allocation2 + $0x8] sm:$0xff] %v775_v60  ;;  %v774_v62 = vsel %vm694_vm2, %v615_v49, %v838_v57  ;;  %v740_v63 = vmul.f32 1.442695, %v717_v58 }
 0x388   :  { %790 = vst [vmem:[#allocation2] sm:$0xff] %v774_v62  ;;  %v738_v0 = vmul.f32 1.442695, %v716_v61 }
 0x389   :  { %1124 = vpow2.f32 %v740_v63 }
 0x38a   :  { %1126 = vpow2.f32 %v738_v0 }
 0x38c   :  { %v984_v1 = vpop.f32.mrb[2].mxu1 }
 0x38d   :  { %v719_v2 = vmin.f32 %v984_v1, 0.0  ;;  %v655_v3 = vpop.f32.mrb[3].mxu1  ;;  %vm703_vm5 = vcmp.gt.f32.partialorder %v984_v1, 0.0 }
 0x38e   :  { %v718_v4 = vmin.f32 %v655_v3, 0.0  ;;  %vm702_vm6 = vcmp.gt.f32.partialorder %v655_v3, 0.0 }
 0x38f   :  { %v744_v6 = vmul.f32 1.442695, %v719_v2 }
 0x390   :  { %v742_v7 = vmul.f32 1.442695, %v718_v4 }
 0x391   :  { %1128 = vpow2.f32 %v744_v6 }
 0x392   :  { %1130 = vpow2.f32 %v742_v7 }
 0x393   :  { %v1125_v9 = vpop.eup %1124 }
 0x394   :  { %v1127_v10 = vpop.eup %1126  ;;  %v845_v11 = vadd.f32 -1.0, %v1125_v9  ;;  %v975_v12 = vpop.f32.mrb[18].mxu0 }
 0x395   :  { %v1464_v13 = vpop.f32.mrb[4].mxu1  ;;  %v844_v14 = vadd.f32 -1.0, %v1127_v10  ;;  %v713_v15 = vmin.f32 %v975_v12, 0.0  ;;  %v625_v8 = vpop.f32.mrb[19].mxu0  ;;  %vm697_vm7 = vcmp.gt.f32.partialorder %v975_v12, 0.0 }
 0x396   :  { %v1466_v5 = vpop.f32.mrb[5].mxu1  ;;  %v781_v16 = vsel %vm701_vm3, %v981_v56, %v845_v11  ;;  %v712_v17 = vmin.f32 %v625_v8, 0.0  ;;  %v721_v18 = vmin.f32 %v1464_v13, 0.0  ;;  %vm696_vm8 = vcmp.gt.f32.partialorder %v625_v8, 0.0 }
 0x397   :  { %797 = vst [vmem:[#allocation2 + $0x38] sm:$0xff] %v781_v16  ;;  %v780_v19 = vsel %vm700_vm4, %v645_v59, %v844_v14  ;;  %v732_v20 = vmul.f32 1.442695, %v713_v15  ;;  %v720_v22 = vmin.f32 %v1466_v5, 0.0  ;;  %vm705_vm9 = vcmp.gt.f32.partialorder %v1464_v13, 0.0 }
 0x398   :  { %796 = vst [vmem:[#allocation2 + $0x30] sm:$0xff] %v780_v19  ;;  %v730_v23 = vmul.f32 1.442695, %v712_v17  ;;  %v748_v21 = vmul.f32 1.442695, %v721_v18  ;;  %vm704_vm10 = vcmp.gt.f32.partialorder %v1466_v5, 0.0 }
 0x399   :  { %1132 = vpow2.f32 %v732_v20  ;;  %v746_v24 = vmul.f32 1.442695, %v720_v22 }
 0x39a   :  { %1134 = vpow2.f32 %v730_v23 }
 0x39b   :  { %v1129_v25 = vpop.eup %1128  ;;  %1136 = vpow2.f32 %v748_v21 }
 0x39c   :  { %v1131_v26 = vpop.eup %1130  ;;  %v847_v27 = vadd.f32 -1.0, %v1129_v25  ;;  %1138 = vpow2.f32 %v746_v24  ;;  %v978_v28 = vpop.f32.mrb[20].mxu0 }
 0x39d   :  { %v1470_v29 = vpop.f32.mrb[6].mxu1  ;;  %v846_v30 = vadd.f32 -1.0, %v1131_v26  ;;  %v715_v31 = vmin.f32 %v978_v28, 0.0  ;;  %v635_v32 = vpop.f32.mrb[21].mxu0  ;;  %vm699_vm11 = vcmp.gt.f32.partialorder %v978_v28, 0.0 }
 0x39e   :  { %v1472_v33 = vpop.f32.mrb[7].mxu1  ;;  %v783_v34 = vsel %vm703_vm5, %v984_v1, %v847_v27  ;;  %v714_v35 = vmin.f32 %v635_v32, 0.0  ;;  %v723_v36 = vmin.f32 %v1470_v29, 0.0  ;;  %vm698_vm12 = vcmp.gt.f32.partialorder %v635_v32, 0.0 }
 0x39f   :  { %799 = vst [vmem:[#allocation2 + $0x48] sm:$0xff] %v783_v34  ;;  %v782_v37 = vsel %vm702_vm6, %v655_v3, %v846_v30  ;;  %v736_v38 = vmul.f32 1.442695, %v715_v31  ;;  %v722_v39 = vmin.f32 %v1472_v33, 0.0  ;;  %vm707_vm13 = vcmp.gt.f32.partialorder %v1470_v29, 0.0 }
 0x3a0   :  { %798 = vst [vmem:[#allocation2 + $0x40] sm:$0xff] %v782_v37  ;;  %v734_v40 = vmul.f32 1.442695, %v714_v35  ;;  %v752_v41 = vmul.f32 1.442695, %v723_v36  ;;  %vm706_vm14 = vcmp.gt.f32.partialorder %v1472_v33, 0.0 }
 0x3a1   :  { %1140 = vpow2.f32 %v736_v38  ;;  %v750_v42 = vmul.f32 1.442695, %v722_v39 }
 0x3a2   :  { %1142 = vpow2.f32 %v734_v40 }
 0x3a3   :  { %v1133_v43 = vpop.eup %1132  ;;  %1144 = vpow2.f32 %v752_v41  ;;  %v993_v44 = vpop.f32.mrb[8].mxu1 }
 0x3a4   :  { %v1135_v45 = vpop.eup %1134  ;;  %v841_v46 = vadd.f32 -1.0, %v1133_v43  ;;  %1146 = vpow2.f32 %v750_v42  ;;  %v725_v47 = vmin.f32 %v993_v44, 0.0  ;;  %v685_v48 = vpop.f32.mrb[9].mxu1  ;;  %vm709_vm15 = vcmp.gt.f32.partialorder %v993_v44, 0.0 }
 0x3a5   :  { %v1137_v49 = vpop.eup %1136  ;;  %v840_v50 = vadd.f32 -1.0, %v1135_v45  ;;  %v724_v51 = vmin.f32 %v685_v48, 0.0  ;;  %vm708_vm0 = vcmp.gt.f32.partialorder %v685_v48, 0.0 }
 0x3a6   :  { %v1139_v52 = vpop.eup %1138  ;;  %v777_v53 = vsel %vm697_vm7, %v975_v12, %v841_v46  ;;  %v849_v54 = vadd.f32 -1.0, %v1137_v49  ;;  %v756_v55 = vmul.f32 1.442695, %v725_v47 }
 0x3a7   :  { %793 = vst [vmem:[#allocation2 + $0x18] sm:$0xff] %v777_v53  ;;  %v776_v56 = vsel %vm696_vm8, %v625_v8, %v840_v50  ;;  %v848_v57 = vadd.f32 -1.0, %v1139_v52  ;;  %v754_v58 = vmul.f32 1.442695, %v724_v51 }
 0x3a8   :  { %792 = vst [vmem:[#allocation2 + $0x10] sm:$0xff] %v776_v56  ;;  %v785_v59 = vsel %vm705_vm9, %v1464_v13, %v849_v54  ;;  %1148 = vpow2.f32 %v756_v55 }
 0x3a9   :  { %801 = vst [vmem:[#allocation2 + $0x58] sm:$0xff] %v785_v59  ;;  %v784_v60 = vsel %vm704_vm10, %v1466_v5, %v848_v57  ;;  %1150 = vpow2.f32 %v754_v58 }
 0x3aa   :  { %800 = vst [vmem:[#allocation2 + $0x50] sm:$0xff] %v784_v60 }
 0x3ab   :  { %v1141_v61 = vpop.eup %1140 }
 0x3ac   :  { %v1143_v62 = vpop.eup %1142  ;;  %v843_v63 = vadd.f32 -1.0, %v1141_v61 }
 0x3ad   :  { %v1145_v0 = vpop.eup %1144  ;;  %v842_v1 = vadd.f32 -1.0, %v1143_v62 }
 0x3ae   :  { %v1147_v2 = vpop.eup %1146  ;;  %v779_v3 = vsel %vm699_vm11, %v978_v28, %v843_v63  ;;  %v851_v4 = vadd.f32 -1.0, %v1145_v0 }
 0x3af   :  { %795 = vst [vmem:[#allocation2 + $0x28] sm:$0xff] %v779_v3  ;;  %v778_v6 = vsel %vm698_vm12, %v635_v32, %v842_v1  ;;  %v850_v7 = vadd.f32 -1.0, %v1147_v2 }
 0x3b0   :  { %794 = vst [vmem:[#allocation2 + $0x20] sm:$0xff] %v778_v6  ;;  %v787_v9 = vsel %vm707_vm13, %v1470_v29, %v851_v4 }
 0x3b1   :  { %803 = vst [vmem:[#allocation2 + $0x68] sm:$0xff] %v787_v9  ;;  %v786_v10 = vsel %vm706_vm14, %v1472_v33, %v850_v7 }
 0x3b2   :  { %v1149_v11 = vpop.eup %1148  ;;  %802 = vst [vmem:[#allocation2 + $0x60] sm:$0xff] %v786_v10 }
 0x3b3   :  { %v1151_v12 = vpop.eup %1150  ;;  %v853_v13 = vadd.f32 -1.0, %v1149_v11 }
 0x3b4   :  { %v852_v14 = vadd.f32 -1.0, %v1151_v12 }
 0x3b5   :  { %v789_v15 = vsel %vm709_vm15, %v993_v44, %v853_v13 }
 0x3b6   :  { %805 = vst [vmem:[#allocation2 + $0x78] sm:$0xff] %v789_v15  ;;  %v788_v8 = vsel %vm708_vm0, %v685_v48, %v852_v14 }
 0x3b7   :  { %804 = vst [vmem:[#allocation2 + $0x70] sm:$0xff] %v788_v8 }
 0x3b8   :  { %1163 = shalt.err (!%p1160_p4)
}
 0x3b9   :  { %s1164_s29 = scalar_lea.hbm %s1499_s3, 2048 }
 0x3ba   :  { %p1165_p5 = scmp.ne.s32.totalorder %s1499_s3, %s1164_s29  ;;  %p1168_p6 = scmp.lt.u32.totalorder %s1164_s29, %s1499_s3 }
 0x3bc   :  { %p1170_p7 = pnand %p1168_p6, %p1165_p5 }
 0x3be   :  { %1173 = shalt.err (!%p1170_p7)
}
 0x3bf   :  { %s1178_s7 = smov 128   ;;  %s1179_s8 = smov 8  }
 0x3c0   :  { %817 = dma.vmem_to_hbm [thread:$0]  %s812_s2, 2048, %s1499_s3, [#allocation3], %s1178_s7, %s1178_s7, %s1179_s8  }
 0x3c1   :  { %1174 = dma.done.wait [#allocation3], 2048  }
 0x3c2   :  { %1175 = vsyncadd [#allocation3], 4294965248 }
 0x3c3   :  { %821 = vsyncpa [#allocation3], 1 }

</bundles_post_ra>
